<compile_context>
chip_gen: v5e
topology: v5e:2x2
jax: 0.10.0
libtpu: 0.0.40
codegen_flags: <defaults>
</compile_context>

<pallas_src>
import functools

import jax
import jax.numpy as jnp
from jax.experimental import pallas as pl
from jax.experimental.pallas import tpu as pltpu

C_IN = 25     # Conv1d in_channels
FEAT = 128    # Conv1d out_channels / d_model (== lane width)
KSIZE = 3     # Conv1d kernel_size


def _cdiv(a, b):
    return -(-a // b)


def _adaptive_windows(L, P):
    # Static window boundaries matching nn.AdaptiveMaxPool1d(P) on input length L
    # (handles P > L too: windows repeat elements, like PyTorch).
    return [((p * L) // P, _cdiv((p + 1) * L, P)) for p in range(P)]


# ---------------------------------------------------------------------------
# Kernel: one batch tile per grid step.  Everything is lane-dense (last dim 128)
# and every reshape regroups sublanes only on multiples of 8.
# ---------------------------------------------------------------------------
def siamese_kernel(x_ref, wc_ref, bc_ref, w1_ref, b1_ref, w2_ref, b2_ref,
                   w3_ref, b3_ref, o_ref, *, bt, l_pad, p_pad, windows):
    rows = 2 * bt * l_pad                              # both encoders, all conv rows
    x = x_ref[...].reshape(rows, FEAT)                 # (rows, 128), 8-aligned collapse

    # Fused im2col Conv1d for both encoders: one (rows,128)@(128,128) MXU matmul (bf16
    # operands by default, f32 accumulation).
    conv = jnp.dot(x, wc_ref[...], preferred_element_type=jnp.float32)
    e = jnp.maximum(conv + bc_ref[...], 0.0)           # + bias, ReLU (f32)
    e = e.reshape(2 * bt, l_pad, FEAT)

    # AdaptiveMaxPool1d: static window bounds -> one cross-sublane max per window over a
    # static row slice (no wrapper-side window replication / gather any more).
    pooled = [jnp.max(e[:, s:t, :], axis=1) for (s, t) in windows]   # each (2*bt, 128)
    pooled += [pooled[-1]] * (p_pad - len(windows))    # pad window count to a sublane mult
    pooled = jnp.stack(pooled, axis=1)                 # (2*bt, p_pad, 128)

    d = jnp.abs(pooled[:bt] - pooled[bt:])             # |enc1 - enc2|, (bt, p_pad, 128)
    d = d.reshape(bt * p_pad, FEAT)                    # p_pad % 8 == 0 -> aligned collapse

    # MLP with lane-padded (zeroed) weights: intermediates stay 128 lanes wide, f32 accum.
    h = jnp.maximum(jnp.dot(d.astype(w1_ref.dtype), w1_ref[...],
                            preferred_element_type=jnp.float32) + b1_ref[...], 0.0)
    h = jnp.maximum(jnp.dot(h.astype(w2_ref.dtype), w2_ref[...],
                            preferred_element_type=jnp.float32) + b2_ref[...], 0.0)
    # Final 32 -> 1 layer: w3 is replicated across all 128 output columns, so the MXU
    # returns the logit already lane-replicated (no cross-lane XLU reduce, unmasked stores).
    logit = jnp.dot(h.astype(w3_ref.dtype), w3_ref[...],
                    preferred_element_type=jnp.float32) + b3_ref[...]
    y = jax.nn.sigmoid(logit)                          # (bt*p_pad, 128) f32
    o_ref[...] = y.reshape(bt, p_pad, FEAT).astype(o_ref.dtype)


# ---------------------------------------------------------------------------
# Wrapper-side layout plumbing (pure XLA data movement, no math).
# ---------------------------------------------------------------------------
def _build_slab(x1, x2, L, l_pad, dtype):
    """(B,T,25) x2 -> (2, B, l_pad, 128): k=3 im2col patches for both encoders, conv rows
    zero-padded to a sublane multiple, channels zero-padded 75 -> 128, single cast."""
    x = jnp.stack([x1, x2], axis=0)                                   # (2, B, T, 25)
    patches = jnp.concatenate([x[:, :, k:k + L, :] for k in range(KSIZE)], axis=-1)
    patches = jnp.pad(patches, ((0, 0), (0, 0), (0, l_pad - L),
                                (0, FEAT - KSIZE * C_IN)))
    return patches.astype(dtype)                                      # (2, B, l_pad, 128)


def _pack_params(params, matmul_dtype):
    """Zero-pad weights to lane-dense 128-wide matrices; biases stay f32 (post-accum add)."""
    wc, bc, w1, b1, w2, b2, w3, b3 = params
    f32 = jnp.float32
    wc_p = jnp.zeros((FEAT, FEAT), f32).at[:KSIZE * C_IN, :].set(
        wc.reshape(KSIZE * C_IN, FEAT).astype(f32))
    w1_p = jnp.zeros((FEAT, FEAT), f32).at[:, :FEAT // 2].set(w1.astype(f32))
    b1_p = jnp.zeros((1, FEAT), f32).at[:, :FEAT // 2].set(b1.astype(f32))
    w2_p = jnp.zeros((FEAT, FEAT), f32).at[:FEAT // 2, :FEAT // 4].set(w2.astype(f32))
    b2_p = jnp.zeros((1, FEAT), f32).at[:, :FEAT // 4].set(b2.astype(f32))
    # w3 replicated across all 128 output columns -> lane-replicated logit out of the MXU.
    w3_p = jnp.zeros((FEAT, FEAT), f32).at[:FEAT // 4, :].set(
        jnp.broadcast_to(w3.astype(f32).reshape(FEAT // 4, 1), (FEAT // 4, FEAT)))
    b3_p = jnp.broadcast_to(b3.astype(f32).reshape(1, 1), (1, FEAT))
    md = matmul_dtype
    return (wc_p.astype(md), bc.astype(f32),
            w1_p.astype(md), b1_p,
            w2_p.astype(md), b2_p,
            w3_p.astype(md), b3_p)


def _choose_batch_tile(B, l_pad, p_pad, in_itemsize):
    """Batch elements per grid step: ~8K conv rows per step (step-overhead amortization)
    under a ~32 MiB working-set cap, with an even number of grid steps (>=2) whenever B
    allows so both v7x TensorCores get equal work."""
    rows_per_elem = 2 * l_pad
    elem_bytes = (2 * rows_per_elem * in_itemsize      # double-buffered input block
                  + rows_per_elem * 4                  # f32 conv + ReLU temporary
                  + 8 * p_pad * 4) * FEAT              # pooled / MLP temps + output bufs
    bt_vmem = max(1, (32 << 20) // elem_bytes)
    bt_rows = max(1, 8192 // rows_per_elem)
    bt = max(1, min(bt_vmem, bt_rows, B))
    if B >= 2:
        bt = min(bt, _cdiv(B, 2))                      # at least 2 steps
        n = _cdiv(B, bt)
        if n > 1 and n % 2 == 1:                       # prefer an even step count (v7x)
            bt = max(1, _cdiv(B, n + 1))
    return bt


def _vmem_limit_bytes(bt, l_pad, p_pad, in_itemsize):
    """Explicit scoped-VMEM budget: block sizes + f32 temps + weights, with 1.5x headroom,
    clamped to [16 MiB, 48 MiB] (safe under v5e/v6e/v7x physical VMEM)."""
    rows = 2 * bt * l_pad
    est = (2 * rows * in_itemsize                      # double-buffered input block
           + 2 * rows * 4                              # f32 conv / ReLU temporaries
           + 10 * bt * p_pad * 4) * FEAT               # pooled/|d|/MLP temps + out buffers
    est += 6 * FEAT * FEAT * 4                         # resident packed weights/biases
    return int(min(max(est * 3 // 2, 16 << 20), 48 << 20))


def siamese_forward(x1, x2, params, pool_out, matmul_dtype=jnp.bfloat16):
    B, T, C = x1.shape
    assert C == C_IN and x2.shape == x1.shape
    assert T >= KSIZE, "Conv1d(k=3) needs T >= 3"
    L = T - (KSIZE - 1)
    P = pool_out
    assert P >= 1

    L_PAD = _cdiv(L, 8) * 8                            # conv rows padded to sublane mult
    P_PAD = _cdiv(P, 8) * 8                            # pool windows padded to sublane mult
    windows = tuple(_adaptive_windows(L, P))           # static per-window (start, end)

    in_itemsize = jnp.dtype(matmul_dtype).itemsize
    bt = _choose_batch_tile(B, L_PAD, P_PAD, in_itemsize)
    n_steps = _cdiv(B, bt)
    B_pad = n_steps * bt

    X = _build_slab(x1, x2, L, L_PAD, matmul_dtype)    # (2, B, L_PAD, 128)
    if B_pad != B:
        X = jnp.pad(X, ((0, 0), (0, B_pad - B), (0, 0), (0, 0)))

    wc_p, bc_p, w1_p, b1_p, w2_p, b2_p, w3_p, b3_p = _pack_params(params, matmul_dtype)

    kernel = functools.partial(siamese_kernel, bt=bt, l_pad=L_PAD, p_pad=P_PAD,
                               windows=windows)

    def full(shape):  # whole-array, grid-invariant block (weights/biases: DMA'd once)
        return pl.BlockSpec(shape, lambda b, _n=len(shape): (0,) * _n)

    in_specs = [
        pl.BlockSpec((2, bt, L_PAD, FEAT), lambda b: (0, b, 0, 0)),   # im2col slab (x1+x2)
        full((FEAT, FEAT)), full((1, FEAT)),                          # packed conv w / b
        full((FEAT, FEAT)), full((1, FEAT)),                          # mlp layer 1 (padded)
        full((FEAT, FEAT)), full((1, FEAT)),                          # mlp layer 2 (padded)
        full((FEAT, FEAT)), full((1, FEAT)),                          # mlp layer 3 (replicated)
    ]
    out_spec = pl.BlockSpec((bt, P_PAD, FEAT), lambda b: (b, 0, 0))

    out = pl.pallas_call(
        kernel,
        out_shape=jax.ShapeDtypeStruct((B_pad, P_PAD, FEAT), jnp.float32),
        grid_spec=pltpu.PrefetchScalarGridSpec(
            num_scalar_prefetch=0, grid=(n_steps,),
            in_specs=in_specs, out_specs=out_spec),
        compiler_params=pltpu.CompilerParams(
            dimension_semantics=("parallel",),
            vmem_limit_bytes=_vmem_limit_bytes(bt, L_PAD, P_PAD, in_itemsize)),
    )(X, wc_p, bc_p, w1_p, b1_p, w2_p, b2_p, w3_p, b3_p)

    # Lane-replicated output: the per-(b, p) scalar sits in every lane; drop batch/window
    # padding and restore the PyTorch (B, P, 1) shape.
    return out[:B, :P, :1]


# ---------------------------------------------------------------------------
# Parameters + pure-JAX reference.
# ---------------------------------------------------------------------------
def init_params(key):
    """Deterministic init (PyTorch-style uniform(-1/sqrt(fan_in), 1/sqrt(fan_in)))."""
    ks = jax.random.split(key, 8)

    def unif(k, shape, fan_in):
        bound = 1.0 / jnp.sqrt(jnp.float32(fan_in))
        return jax.random.uniform(k, shape, jnp.float32, -bound, bound)

    wc = unif(ks[0], (KSIZE, C_IN, FEAT), C_IN * KSIZE)   # conv weight, layout (k, cin, cout)
    bc = unif(ks[1], (1, FEAT), C_IN * KSIZE)
    w1 = unif(ks[2], (FEAT, FEAT // 2), FEAT)
    b1 = unif(ks[3], (1, FEAT // 2), FEAT)
    w2 = unif(ks[4], (FEAT // 2, FEAT // 4), FEAT // 2)
    b2 = unif(ks[5], (1, FEAT // 4), FEAT // 2)
    w3 = unif(ks[6], (FEAT // 4, 1), FEAT // 4)
    b3 = unif(ks[7], (1, 1), FEAT // 4)
    return (wc, bc, w1, b1, w2, b2, w3, b3)


def reference_forward(x1, x2, params, pool_out):
    """Pure-JAX reference for correctness checking."""
    wc, bc, w1, b1, w2, b2, w3, b3 = params
    B, T, _ = x1.shape
    L = T - (KSIZE - 1)

    def enc(x):
        y = jnp.zeros((B, L, FEAT), jnp.float32)
        for k in range(KSIZE):
            y = y + jnp.einsum('btc,co->bto', x[:, k:k + L, :].astype(jnp.float32), wc[k],
                               preferred_element_type=jnp.float32)
        y = jnp.maximum(y + bc[None], 0.0)
        rows = [jnp.max(y[:, s:t, :], axis=1, keepdims=True)
                for (s, t) in _adaptive_windows(L, pool_out)]
        return jnp.concatenate(rows, axis=1)

    d = jnp.abs(enc(x1) - enc(x2))
    h = jnp.maximum(d @ w1 + b1[None], 0.0)
    h = jnp.maximum(h @ w2 + b2[None], 0.0)
    return jax.nn.sigmoid(h @ w3 + b3[None])


if __name__ == "__main__":
    key = jax.random.PRNGKey(0)
    k_params, k_a1, k_a2, k_b1, k_b2 = jax.random.split(key, 5)
    params = init_params(k_params)

    # Config A: uniform adaptive-pool windows (L % P == 0), 2 parallel grid steps.
    B, T, P = 4, 18, 8
    xa1 = jax.random.normal(k_a1, (B, T, C_IN), jnp.float32)
    xa2 = jax.random.normal(k_a2, (B, T, C_IN), jnp.float32)
    ref_a = jax.block_until_ready(reference_forward(xa1, xa2, params, P))

    out_a32 = jax.block_until_ready(
        siamese_forward(xa1, xa2, params, P, matmul_dtype=jnp.float32))
    assert out_a32.shape == (B, P, 1)
    assert jnp.allclose(out_a32, ref_a, atol=1e-4, rtol=1e-4), "config A (f32) mismatch"

    # Default path: bf16 matmul operands everywhere (f32 accumulation); looser tolerance.
    out_abf = jax.block_until_ready(siamese_forward(xa1, xa2, params, P))
    assert out_abf.shape == (B, P, 1)
    assert jnp.allclose(out_abf, ref_a, atol=5e-2, rtol=5e-2), "config A (bf16) mismatch"

    # Config B: non-uniform (overlapping) adaptive windows + padded pool dim (P % 8 != 0).
    B, T, P = 2, 16, 6
    xb1 = jax.random.normal(k_b1, (B, T, C_IN), jnp.float32)
    xb2 = jax.random.normal(k_b2, (B, T, C_IN), jnp.float32)
    ref_b = jax.block_until_ready(reference_forward(xb1, xb2, params, P))
    out_b32 = jax.block_until_ready(
        siamese_forward(xb1, xb2, params, P, matmul_dtype=jnp.float32))
    assert out_b32.shape == (B, P, 1)
    assert jnp.allclose(out_b32, ref_b, atol=1e-4, rtol=1e-4), "config B (f32) mismatch"

    # Config C: pool output longer than the conv output (repeated elements, like PyTorch).
    B, T, P = 2, 11, 12
    xc1 = jax.random.normal(k_b1, (B, T, C_IN), jnp.float32)
    xc2 = jax.random.normal(k_b2, (B, T, C_IN), jnp.float32)
    ref_c = jax.block_until_ready(reference_forward(xc1, xc2, params, P))
    out_c32 = jax.block_until_ready(
        siamese_forward(xc1, xc2, params, P, matmul_dtype=jnp.float32))
    assert out_c32.shape == (B, P, 1)
    assert jnp.allclose(out_c32, ref_c, atol=1e-4, rtol=1e-4), "config C (f32) mismatch"

    print("KERNEL_OK")
</pallas_src>

<mosaic_0001>
module attributes {stable_mosaic.version = 11 : i64} {
  func.func @siamese_kernel(%arg0: i32, %arg1: memref<2x2x16x128xf32, #tpu.memory_space<vmem>>, %arg2: memref<128x128xf32, #tpu.memory_space<vmem>>, %arg3: memref<1x128xf32, #tpu.memory_space<vmem>>, %arg4: memref<128x128xf32, #tpu.memory_space<vmem>>, %arg5: memref<1x128xf32, #tpu.memory_space<vmem>>, %arg6: memref<128x128xf32, #tpu.memory_space<vmem>>, %arg7: memref<1x128xf32, #tpu.memory_space<vmem>>, %arg8: memref<128x128xf32, #tpu.memory_space<vmem>>, %arg9: memref<1x128xf32, #tpu.memory_space<vmem>>, %arg10: memref<2x8x128xf32, #tpu.memory_space<vmem>>) attributes {dimension_semantics = [#tpu.dimension_semantics<parallel>], iteration_bounds = array<i64: 2>, scalar_prefetch = 0 : i64, scratch_operands = 0 : i64, tpu.core_type = #tpu.core_type<tc>, window_params = [{transform_indices = @transform_0, window_bounds = array<i64: 2, 2, 16, 128>}, {pipeline_mode = #tpu.pipeline_mode<synchronous>, transform_indices = @transform_1, window_bounds = array<i64: 128, 128>}, {pipeline_mode = #tpu.pipeline_mode<synchronous>, transform_indices = @transform_2, window_bounds = array<i64: 1, 128>}, {pipeline_mode = #tpu.pipeline_mode<synchronous>, transform_indices = @transform_3, window_bounds = array<i64: 128, 128>}, {pipeline_mode = #tpu.pipeline_mode<synchronous>, transform_indices = @transform_4, window_bounds = array<i64: 1, 128>}, {pipeline_mode = #tpu.pipeline_mode<synchronous>, transform_indices = @transform_5, window_bounds = array<i64: 128, 128>}, {pipeline_mode = #tpu.pipeline_mode<synchronous>, transform_indices = @transform_6, window_bounds = array<i64: 1, 128>}, {pipeline_mode = #tpu.pipeline_mode<synchronous>, transform_indices = @transform_7, window_bounds = array<i64: 128, 128>}, {pipeline_mode = #tpu.pipeline_mode<synchronous>, transform_indices = @transform_8, window_bounds = array<i64: 1, 128>}, {transform_indices = @transform_9, window_bounds = array<i64: 2, 8, 128>}]} {
    %c0 = arith.constant 0 : index
    %c0_0 = arith.constant 0 : index
    %c0_1 = arith.constant 0 : index
    %c0_2 = arith.constant 0 : index
    %0 = vector.load %arg1[%c0, %c0_0, %c0_1, %c0_2] : memref<2x2x16x128xf32, #tpu.memory_space<vmem>>, vector<2x2x16x128xf32>
    %1 = vector.shape_cast %0 : vector<2x2x16x128xf32> to vector<64x128xf32>
    %c0_3 = arith.constant 0 : index
    %c0_4 = arith.constant 0 : index
    %2 = vector.load %arg2[%c0_3, %c0_4] : memref<128x128xf32, #tpu.memory_space<vmem>>, vector<128x128xf32>
    %cst = arith.constant dense<0.000000e+00> : vector<64x128xf32>
    %3 = tpu.matmul %1, %2, %cst {dimension_numbers = #tpu.dot_dimension_numbers<[1], [0], [0], [1], [0, 0, 1, 1], [], []>} : vector<64x128xf32>, vector<128x128xf32>, vector<64x128xf32> -> vector<64x128xf32>
    %c0_5 = arith.constant 0 : index
    %c0_6 = arith.constant 0 : index
    %4 = vector.load %arg3[%c0_5, %c0_6] : memref<1x128xf32, #tpu.memory_space<vmem>>, vector<1x128xf32>
    %5 = vector.broadcast %4 : vector<1x128xf32> to vector<64x128xf32>
    %6 = arith.addf %3, %5 : vector<64x128xf32>
    %cst_7 = arith.constant 0.000000e+00 : f32
    %7 = vector.broadcast %cst_7 : f32 to vector<64x128xf32>
    %8 = arith.maximumf %6, %7 : vector<64x128xf32>
    %9 = vector.shape_cast %8 : vector<64x128xf32> to vector<4x16x128xf32>
    %10 = vector.extract_strided_slice %9 {offsets = [0, 0, 0], sizes = [4, 2, 128], strides = [1, 1, 1]} : vector<4x16x128xf32> to vector<4x2x128xf32>
    %cst_8 = arith.constant dense<0xFF800000> : vector<4x128xf32>
    %11 = vector.multi_reduction <maximumf>, %10, %cst_8 [1] : vector<4x2x128xf32> to vector<4x128xf32>
    %12 = vector.extract_strided_slice %9 {offsets = [0, 2, 0], sizes = [4, 2, 128], strides = [1, 1, 1]} : vector<4x16x128xf32> to vector<4x2x128xf32>
    %cst_9 = arith.constant dense<0xFF800000> : vector<4x128xf32>
    %13 = vector.multi_reduction <maximumf>, %12, %cst_9 [1] : vector<4x2x128xf32> to vector<4x128xf32>
    %14 = vector.extract_strided_slice %9 {offsets = [0, 4, 0], sizes = [4, 2, 128], strides = [1, 1, 1]} : vector<4x16x128xf32> to vector<4x2x128xf32>
    %cst_10 = arith.constant dense<0xFF800000> : vector<4x128xf32>
    %15 = vector.multi_reduction <maximumf>, %14, %cst_10 [1] : vector<4x2x128xf32> to vector<4x128xf32>
    %16 = vector.extract_strided_slice %9 {offsets = [0, 6, 0], sizes = [4, 2, 128], strides = [1, 1, 1]} : vector<4x16x128xf32> to vector<4x2x128xf32>
    %cst_11 = arith.constant dense<0xFF800000> : vector<4x128xf32>
    %17 = vector.multi_reduction <maximumf>, %16, %cst_11 [1] : vector<4x2x128xf32> to vector<4x128xf32>
    %18 = vector.extract_strided_slice %9 {offsets = [0, 8, 0], sizes = [4, 2, 128], strides = [1, 1, 1]} : vector<4x16x128xf32> to vector<4x2x128xf32>
    %cst_12 = arith.constant dense<0xFF800000> : vector<4x128xf32>
    %19 = vector.multi_reduction <maximumf>, %18, %cst_12 [1] : vector<4x2x128xf32> to vector<4x128xf32>
    %20 = vector.extract_strided_slice %9 {offsets = [0, 10, 0], sizes = [4, 2, 128], strides = [1, 1, 1]} : vector<4x16x128xf32> to vector<4x2x128xf32>
    %cst_13 = arith.constant dense<0xFF800000> : vector<4x128xf32>
    %21 = vector.multi_reduction <maximumf>, %20, %cst_13 [1] : vector<4x2x128xf32> to vector<4x128xf32>
    %22 = vector.extract_strided_slice %9 {offsets = [0, 12, 0], sizes = [4, 2, 128], strides = [1, 1, 1]} : vector<4x16x128xf32> to vector<4x2x128xf32>
    %cst_14 = arith.constant dense<0xFF800000> : vector<4x128xf32>
    %23 = vector.multi_reduction <maximumf>, %22, %cst_14 [1] : vector<4x2x128xf32> to vector<4x128xf32>
    %24 = vector.extract_strided_slice %9 {offsets = [0, 14, 0], sizes = [4, 2, 128], strides = [1, 1, 1]} : vector<4x16x128xf32> to vector<4x2x128xf32>
    %cst_15 = arith.constant dense<0xFF800000> : vector<4x128xf32>
    %25 = vector.multi_reduction <maximumf>, %24, %cst_15 [1] : vector<4x2x128xf32> to vector<4x128xf32>
    %26 = vector.shape_cast %11 : vector<4x128xf32> to vector<4x1x128xf32>
    %27 = vector.shape_cast %13 : vector<4x128xf32> to vector<4x1x128xf32>
    %28 = vector.shape_cast %15 : vector<4x128xf32> to vector<4x1x128xf32>
    %29 = vector.shape_cast %17 : vector<4x128xf32> to vector<4x1x128xf32>
    %30 = vector.shape_cast %19 : vector<4x128xf32> to vector<4x1x128xf32>
    %31 = vector.shape_cast %21 : vector<4x128xf32> to vector<4x1x128xf32>
    %32 = vector.shape_cast %23 : vector<4x128xf32> to vector<4x1x128xf32>
    %33 = vector.shape_cast %25 : vector<4x128xf32> to vector<4x1x128xf32>
    %34 = tpu.concatenate %26, %27, %28, %29, %30, %31, %32, %33 in 1 : vector<4x1x128xf32>, vector<4x1x128xf32>, vector<4x1x128xf32>, vector<4x1x128xf32>, vector<4x1x128xf32>, vector<4x1x128xf32>, vector<4x1x128xf32>, vector<4x1x128xf32> -> vector<4x8x128xf32>
    %35 = vector.extract_strided_slice %34 {offsets = [0, 0, 0], sizes = [2, 8, 128], strides = [1, 1, 1]} : vector<4x8x128xf32> to vector<2x8x128xf32>
    %36 = vector.extract_strided_slice %34 {offsets = [2, 0, 0], sizes = [2, 8, 128], strides = [1, 1, 1]} : vector<4x8x128xf32> to vector<2x8x128xf32>
    %37 = arith.subf %35, %36 : vector<2x8x128xf32>
    %38 = math.absf %37 : vector<2x8x128xf32>
    %39 = vector.shape_cast %38 : vector<2x8x128xf32> to vector<16x128xf32>
    %c0_16 = arith.constant 0 : index
    %c0_17 = arith.constant 0 : index
    %40 = vector.load %arg4[%c0_16, %c0_17] : memref<128x128xf32, #tpu.memory_space<vmem>>, vector<128x128xf32>
    %cst_18 = arith.constant dense<0.000000e+00> : vector<16x128xf32>
    %41 = tpu.matmul %39, %40, %cst_18 {dimension_numbers = #tpu.dot_dimension_numbers<[1], [0], [0], [1], [0, 0, 1, 1], [], []>} : vector<16x128xf32>, vector<128x128xf32>, vector<16x128xf32> -> vector<16x128xf32>
    %c0_19 = arith.constant 0 : index
    %c0_20 = arith.constant 0 : index
    %42 = vector.load %arg5[%c0_19, %c0_20] : memref<1x128xf32, #tpu.memory_space<vmem>>, vector<1x128xf32>
    %43 = vector.broadcast %42 : vector<1x128xf32> to vector<16x128xf32>
    %44 = arith.addf %41, %43 : vector<16x128xf32>
    %cst_21 = arith.constant 0.000000e+00 : f32
    %45 = vector.broadcast %cst_21 : f32 to vector<16x128xf32>
    %46 = arith.maximumf %44, %45 : vector<16x128xf32>
    %c0_22 = arith.constant 0 : index
    %c0_23 = arith.constant 0 : index
    %47 = vector.load %arg6[%c0_22, %c0_23] : memref<128x128xf32, #tpu.memory_space<vmem>>, vector<128x128xf32>
    %cst_24 = arith.constant dense<0.000000e+00> : vector<16x128xf32>
    %48 = tpu.matmul %46, %47, %cst_24 {dimension_numbers = #tpu.dot_dimension_numbers<[1], [0], [0], [1], [0, 0, 1, 1], [], []>} : vector<16x128xf32>, vector<128x128xf32>, vector<16x128xf32> -> vector<16x128xf32>
    %c0_25 = arith.constant 0 : index
    %c0_26 = arith.constant 0 : index
    %49 = vector.load %arg7[%c0_25, %c0_26] : memref<1x128xf32, #tpu.memory_space<vmem>>, vector<1x128xf32>
    %50 = vector.broadcast %49 : vector<1x128xf32> to vector<16x128xf32>
    %51 = arith.addf %48, %50 : vector<16x128xf32>
    %cst_27 = arith.constant 0.000000e+00 : f32
    %52 = vector.broadcast %cst_27 : f32 to vector<16x128xf32>
    %53 = arith.maximumf %51, %52 : vector<16x128xf32>
    %c0_28 = arith.constant 0 : index
    %c0_29 = arith.constant 0 : index
    %54 = vector.load %arg8[%c0_28, %c0_29] : memref<128x128xf32, #tpu.memory_space<vmem>>, vector<128x128xf32>
    %cst_30 = arith.constant dense<0.000000e+00> : vector<16x128xf32>
    %55 = tpu.matmul %53, %54, %cst_30 {dimension_numbers = #tpu.dot_dimension_numbers<[1], [0], [0], [1], [0, 0, 1, 1], [], []>} : vector<16x128xf32>, vector<128x128xf32>, vector<16x128xf32> -> vector<16x128xf32>
    %c0_31 = arith.constant 0 : index
    %c0_32 = arith.constant 0 : index
    %56 = vector.load %arg9[%c0_31, %c0_32] : memref<1x128xf32, #tpu.memory_space<vmem>>, vector<1x128xf32>
    %57 = vector.broadcast %56 : vector<1x128xf32> to vector<16x128xf32>
    %58 = arith.addf %55, %57 : vector<16x128xf32>
    %59 = arith.negf %58 : vector<16x128xf32>
    %60 = math.exp %59 : vector<16x128xf32>
    %cst_33 = arith.constant 1.000000e+00 : f32
    %61 = vector.broadcast %cst_33 : f32 to vector<16x128xf32>
    %62 = arith.addf %61, %60 : vector<16x128xf32>
    %63 = arith.divf %61, %62 : vector<16x128xf32>
    %64 = vector.shape_cast %63 : vector<16x128xf32> to vector<2x8x128xf32>
    %c0_34 = arith.constant 0 : index
    %c0_35 = arith.constant 0 : index
    %c0_36 = arith.constant 0 : index
    %65 = vector.load %arg10[%c0_34, %c0_35, %c0_36] : memref<2x8x128xf32, #tpu.memory_space<vmem>>, vector<2x8x128xf32>
    tpu.vector_store %arg10[%c0_34, %c0_35, %c0_36], %64 {strides = array<i32>} : memref<2x8x128xf32, #tpu.memory_space<vmem>>, vector<2x8x128xf32>,
    return
  }
  func.func @transform_0(%arg0: i32) -> (i32, i32, i32, i32) {
    %c0_i32 = arith.constant 0 : i32
    %c0_i32_0 = arith.constant 0 : i32
    %c0_i32_1 = arith.constant 0 : i32
    %c0_i32_2 = arith.constant 0 : i32
    return %c0_i32, %arg0, %c0_i32_0, %c0_i32_1 : i32, i32, i32, i32
  }
  func.func @transform_1(%arg0: i32) -> (i32, i32) {
    %c0_i32 = arith.constant 0 : i32
    %c0_i32_0 = arith.constant 0 : i32
    %c0_i32_1 = arith.constant 0 : i32
    return %c0_i32, %c0_i32_0 : i32, i32
  }
  func.func @transform_2(%arg0: i32) -> (i32, i32) {
    %c0_i32 = arith.constant 0 : i32
    %c0_i32_0 = arith.constant 0 : i32
    %c0_i32_1 = arith.constant 0 : i32
    return %c0_i32, %c0_i32_0 : i32, i32
  }
  func.func @transform_3(%arg0: i32) -> (i32, i32) {
    %c0_i32 = arith.constant 0 : i32
    %c0_i32_0 = arith.constant 0 : i32
    %c0_i32_1 = arith.constant 0 : i32
    return %c0_i32, %c0_i32_0 : i32, i32
  }
  func.func @transform_4(%arg0: i32) -> (i32, i32) {
    %c0_i32 = arith.constant 0 : i32
    %c0_i32_0 = arith.constant 0 : i32
    %c0_i32_1 = arith.constant 0 : i32
    return %c0_i32, %c0_i32_0 : i32, i32
  }
  func.func @transform_5(%arg0: i32) -> (i32, i32) {
    %c0_i32 = arith.constant 0 : i32
    %c0_i32_0 = arith.constant 0 : i32
    %c0_i32_1 = arith.constant 0 : i32
    return %c0_i32, %c0_i32_0 : i32, i32
  }
  func.func @transform_6(%arg0: i32) -> (i32, i32) {
    %c0_i32 = arith.constant 0 : i32
    %c0_i32_0 = arith.constant 0 : i32
    %c0_i32_1 = arith.constant 0 : i32
    return %c0_i32, %c0_i32_0 : i32, i32
  }
  func.func @transform_7(%arg0: i32) -> (i32, i32) {
    %c0_i32 = arith.constant 0 : i32
    %c0_i32_0 = arith.constant 0 : i32
    %c0_i32_1 = arith.constant 0 : i32
    return %c0_i32, %c0_i32_0 : i32, i32
  }
  func.func @transform_8(%arg0: i32) -> (i32, i32) {
    %c0_i32 = arith.constant 0 : i32
    %c0_i32_0 = arith.constant 0 : i32
    %c0_i32_1 = arith.constant 0 : i32
    return %c0_i32, %c0_i32_0 : i32, i32
  }
  func.func @transform_9(%arg0: i32) -> (i32, i32, i32) {
    %c0_i32 = arith.constant 0 : i32
    %c0_i32_0 = arith.constant 0 : i32
    %c0_i32_1 = arith.constant 0 : i32
    return %arg0, %c0_i32, %c0_i32_0 : i32, i32, i32
  }
}

</mosaic_0001>

<bundles_post_ra>
// kernel: tpu_custom_call.1
= control target key start
LH: loop header
LB: loop body
LE: loop exit
PB: predicated region body
PF: predicated region fallthrough
CT: control target
= control target key end

     0   :  { %s1867_s0 = inlined_call_operand.hbm [shape: f32[2,4,16,128], index: 0, kind: input, shape index: {}]   ;;  %s1868_s1 = inlined_call_operand.hbm [shape: f32[128,128], index: 1, kind: input, shape index: {}]   ;;  %s1869_s2 = inlined_call_operand.vmem [shape: f32[1,128], index: 2, kind: input, shape index: {}]   ;;  %s1870_s3 = inlined_call_operand.hbm [shape: f32[128,128], index: 3, kind: input, shape index: {}]   ;;  %s1871_s4 = inlined_call_operand.vmem [shape: f32[1,128], index: 4, kind: input, shape index: {}]   ;;  %s1872_s5 = inlined_call_operand.hbm [shape: f32[128,128], index: 5, kind: input, shape index: {}]   ;;  %s1873_s6 = inlined_call_operand.vmem [shape: f32[1,128], index: 6, kind: input, shape index: {}]   ;;  %s1874_s7 = inlined_call_operand.hbm [shape: f32[128,128], index: 7, kind: input, shape index: {}]   ;;  %s1875_s8 = inlined_call_operand.vmem [shape: f32[1,128], index: 8, kind: input, shape index: {}]   ;;  %s1876_s9 = inlined_call_operand.hbm [shape: f32[4,8,128], index: 9, kind: output, shape index: {}]  }
   0x1   :  { %1883 = sst [smem:[#allocation24_spill]] %s1868_s1 }
   0x2   :  { %1884 = sst [smem:[#allocation25_spill]] %s1872_s5 }
   0x3   :  { %14 = vsyncpa [#allocation3], 0 }
   0x4   :  { %16 = vsyncpa [#allocation3 + $0x1], 0 }
   0x5   :  { %17 = vsyncpa [#allocation6], 0 }
   0x6   :  { %18 = vsyncpa [#allocation9], 0 }
   0x7   :  { %19 = vsyncpa [#allocation4], 0 }
   0x8   :  { %21 = vsyncpa [#allocation4 + $0x1], 0  ;;  %s1507_s30 = smov 0   ;;  %s1509_s10 = smov 0  }
   0x9   :  { %s1511_s11 = smov 0   ;;  %s1513_s12 = smov 0  }
   0xa LB: > { %1885 = sst [smem:[#allocation19_spill]] %s1429_s30  ;;  %s1528_s13 = sadd.s32 4294967295, %s1441_s12   ;;  %s1441_s12 = sphi %s1513_s12, %s1901_s12   ;;  %s1437_s11 = sphi %s1511_s11, %s1905_s11   ;;  %s1433_s10 = sphi %s1509_s10, %s1904_s10   ;;  %s1429_s30 = sphi %s1507_s30, %s1903_s30  }
   0xb   : > { %s1090_s14 = sadd.s32 4294967294, %s1441_s12   ;;  %s1532_s15 = sadd.s32 1, %s1441_s12  }
   0xc   : > { %1886 = sst [smem:[#allocation20_spill]] %s1532_s15  ;;  %s34_s16 = sadd.s32 1, %s1437_s11 }
   0xd   : > { %s31_s17 = ssub.s32 %s1441_s12, %s1532_s15  ;;  %p41_p0 = scmp.ne.s32.totalorder %s1437_s11, %s1433_s10 }
   0xe   : > { %p32_p1 = scmp.eq.s32.totalorder %s31_s17, 0  ;;  %p42_p2 = scmp.eq.s32.totalorder %s1441_s12, 0 }
   0xf   : > { %p47_p3 = scmp.ne.s32.totalorder %s1433_s10, %s1429_s30  ;;  %p48_p4 = scmp.eq.s32.totalorder %s1528_s13, 0 }
  0x10   : > { %s1544_s18 = scalar_select %p32_p1, %s1437_s11, %s34_s16  }
  0x11   : > { %p1546_p5 = por %p42_p2, %p41_p0  ;;  %p1552_p6 = por %p48_p4, %p47_p3 }
  0x12   : > { %1887 = sst [smem:[#allocation21_spill]] %s1544_s18  ;;  %p239_p7 = scmp.eq.s32.totalorder %s1528_s13, 1 }
  0x13   : > { %p245_p8 = scmp.eq.s32.totalorder %s1090_s14, 1  ;;  %p1091_p9 = scmp.ge.s32.totalorder %s1441_s12, 1 }
  0x14   : > { %p252_p10 = scmp.lt.s32.totalorder %s1441_s12, 3  ;;  %p1559_p11 = por %p239_p7, %p41_p0 }
  0x15   : > { %p1563_p12 = por %p245_p8, %p47_p3  ;;  %s1895_s1 = sld [smem:[#allocation24_spill]] }
  0x16   : > { %s1890_s21 = scalar_select %p1559_p11, 1, 0 }
  0x17   : > { %s1892_s22 = scalar_select %p1563_p12, 1, 0 }
  0x18   : > { %1891 = sst [smem:[#allocation22_spill]] %s1890_s21  ;;  %p1567_p13 = pnand %p1091_p9, %p252_p10 }
  0x19   : > { %1893 = sst [smem:[#allocation23_spill]] %s1892_s22  ;;  %s1443_s27 = smov [#allocation5]  }
  0x1a   : > { %p1163_p1 = pneg %p1567_p13  ;;  %s265_s28 = sshll.u32 %s1443_s27, 4  ;;  %s266_s28 = int_to_ptr.vmem [resolvable:$true] %s265_s28 }
  0x1b   : > { %s263_s26 = sshll.u32 %s1895_s1, 4  ;;  %s1897_s5 = sld [smem:[#allocation25_spill]]  ;;  %s264_s26 = int_to_ptr.hbm [resolvable:$true] %s263_s26 }
  0x1c   : > { %p1578_p0 = pnand %p1163_p1, %p48_p4  ;;  %s1444_s24 = smov 128  }
  0x1d   : > { %s1445_s25 = smov 8   ;;  %s280_s18 = sshll.u32 %s1870_s3, 4  ;;  %s281_s18 = int_to_ptr.hbm [resolvable:$true] %s280_s18 }
  0x1e   : > { %1166 = dma.hbm_to_vmem [thread:$0]  (!%p1578_p0), %s264_s26, 2048, %s266_s28, [#allocation6], %s1444_s24, %s1444_s24, %s1445_s25  }
  0x1f   : > { %s1446_s15 = smov [#allocation8]   ;;  %s1447_s14 = smov [#allocation7]  }
  0x20   : > { %s299_s22 = sshll.u32 %s1446_s15, 4  ;;  %s282_s16 = sshll.u32 %s1447_s14, 4  ;;  %s300_s22 = int_to_ptr.vmem [resolvable:$true] %s299_s22  ;;  %s283_s16 = int_to_ptr.vmem [resolvable:$true] %s282_s16 }
  0x21   : > { %s297_s17 = sshll.u32 %s1897_s5, 4  ;;  %s314_s21 = sshll.u32 %s1874_s7, 4  ;;  %s298_s17 = int_to_ptr.hbm [resolvable:$true] %s297_s17  ;;  %s315_s21 = int_to_ptr.hbm [resolvable:$true] %s314_s21 }
  0x22   : > { %1172 = dma.hbm_to_vmem [thread:$0]  (!%p1578_p0), %s298_s17, 2048, %s300_s22, [#allocation9], %s1444_s24, %s1444_s24, %s1445_s25  }
  0x23   : > { %1169 = dma.hbm_to_vmem [thread:$0]  (!%p1578_p0), %s281_s18, 2048, %s283_s16, [#allocation6], %s1444_s24, %s1444_s24, %s1445_s25  }
  0x24   : > { %s1448_s26 = smov [#allocation10]   ;;  %p1096_p2 = scmp.ge.s32.totalorder %s1441_s12, 2 }
  0x25   : > { %s316_s1 = sshll.u32 %s1448_s26, 4  ;;  %s317_s1 = int_to_ptr.vmem [resolvable:$true] %s316_s1 }
  0x26   : > { %1175 = dma.hbm_to_vmem [thread:$0]  (!%p1578_p0), %s315_s21, 2048, %s317_s1, [#allocation9], %s1444_s24, %s1444_s24, %s1445_s25  }
  0x27   : > { %329 = sbr.rel (%p1096_p2) target bundleno = 58 (0x3a), region = 48 }
  0x2c   : > { %s333_s5 = sand.u32 1, %s1437_s11   ;;  %s1118_s30 = sshll.u32 %s1441_s12, 5 }
  0x2d   : > { %s1097_s15 = sshll.u32 %s333_s5, 6  ;;  %s343_s28 = scalar_lea.hbm %s1867_s0, %s1118_s30 }
  0x2e   : > { %s1144_s21 = scalar_select %p1546_p5, [#allocation0], [#allocation14] }
  0x2f   : > { %s356_s29 = sshll.u32 %s343_s28, 4  ;;  %s337_s17 = scalar_lea.vmem [#allocation2], %s1097_s15  ;;  %s357_s29 = int_to_ptr.hbm [resolvable:$true] %s356_s29 }
  0x30   : > { %s358_s24 = sshll.u32 %s337_s17, 4  ;;  %s348_s25 = sld [smem:[%s1144_s21]]   ;;  %s359_s24 = int_to_ptr.vmem [resolvable:$true] %s358_s24 }
  0x31   : > { %s1449_s27 = smov 1024   ;;  %s1450_s14 = smov 512  }
  0x32   : > { %1145 = sst [smem:[#allocation13]] (%p1546_p5), %s1449_s27  ;;  %s1451_s16 = smov 4  }
  0x33   : > { %1146 = sst [smem:[#allocation13 + $0x1]] (%p1546_p5), %s1450_s14  ;;  %s1452_s26 = smov 128  }
  0x34   : > { %1147 = sst [smem:[#allocation13 + $0x2]] (%p1546_p5), %s1451_s16  ;;  %s1453_s15 = smov 8  }
  0x35   : > { %1148 = sst [smem:[#allocation13 + $0x3]] (%p1546_p5), %s1452_s26  ;;  %s334_s18 = scalar_lea.sflag [#allocation3], %s333_s5 }
  0x36   : > { %s1101_s1 = sshll.u32 %s348_s25, 26  ;;  %1149 = sst [smem:[#allocation13 + $0x4]] (%p1546_p5), %s1452_s26 }
  0x37   : > { %s1102_s30 = sadd.s32 134217728, %s1101_s1  ;;  %1150 = sst [smem:[#allocation13 + $0x5]] (%p1546_p5), %s1453_s15 }
  0x38   : > { %s1454_s22 = smov [#allocation12]  }
  0x39   : > { %1151 = dma.general (%p1546_p5), %s357_s29, 1024, %s359_s24, %s334_s18, %s1454_s22, [#allocation13], %s1102_s30, 0  }
  0x3a PF: > { %383 = sbr.rel (%p1567_p13) target bundleno = 735 (0x2df), region = 56  ;;  %s1626_s28 = sand.u32 (!%p1567_p13), 1, %s1433_s10  }
  0x3b   : > { %s1104_s21 = sshll.u32 (!%p1567_p13), %s1626_s28, 6  ;;  %s386_s17 = scalar_lea.sflag (!%p1567_p13), [#allocation3], %s1626_s28 }
  0x3c   : > { %s1630_s25 = scalar_lea.vmem (!%p1567_p13), [#allocation2], %s1104_s21 }
  0x3f   : > { %1412 = dma.done.wait (%p1552_p6), %s386_s17, 1024  }
  0x40   : > { %1414 = vsyncadd (%p1552_p6), %s386_s17, 4294966272 }
  0x41   : > { %1416 = dma.done.wait (%p48_p4), [#allocation6], 4096  }
  0x42   : > { %1418 = vsyncadd (%p48_p4), [#allocation6], 4294963200 }
  0x43   : > { %1420 = dma.done.wait (%p48_p4), [#allocation9], 4096  }
  0x44   : > { %1422 = vsyncadd (%p48_p4), [#allocation9], 4294963200  ;;  %v470_v0 = vld [vmem:[#allocation5 + $0x78] sm:$0xff]  ;;  %v469_v1 = vld [vmem:[#allocation5 + $0x70] sm:$0xff]  ;;  %vm524_vm0 = vcmask 1041408   ;;  %vm553_vm1 = vcmask 1043458  }
  0x45   : > { %475 = vmatpush.msra.mxu0 %v470_v0  ;;  %1120 = vmatpush.msra.mxu1 %v470_v0  ;;  %v468_v2 = vld [vmem:[#allocation5 + $0x68] sm:$0xff]  ;;  %v467_v3 = vld [vmem:[#allocation5 + $0x60] sm:$0xff]  ;;  %v466_v4 = vld [vmem:[#allocation5 + $0x58] sm:$0xff]  ;;  %vm582_vm2 = vcmask 1045508   ;;  %vm611_vm3 = vcmask 1047558   ;;  %vm752_vm4 = vcmask 1040384  }
  0x46   : > { %v465_v5 = vld [vmem:[#allocation5 + $0x50] sm:$0xff]  ;;  %v464_v6 = vld [vmem:[#allocation5 + $0x48] sm:$0xff]  ;;  %v463_v7 = vld [vmem:[#allocation5 + $0x40] sm:$0xff]  ;;  %vm761_vm5 = vcmask 1042432   ;;  %vm766_vm6 = vcmask 1043456   ;;  %vm771_vm7 = vcmask 1044480  }
  0x47   : > { %476 = vmatpush.msra.mxu0 %v469_v1  ;;  %1121 = vmatpush.msra.mxu1 %v469_v1  ;;  %v462_v8 = vld [vmem:[#allocation5 + $0x38] sm:$0xff]  ;;  %v461_v9 = vld [vmem:[#allocation5 + $0x30] sm:$0xff]  ;;  %v460_v10 = vld [vmem:[#allocation5 + $0x28] sm:$0xff]  ;;  %vm776_vm8 = vcmask 1045504   ;;  %vm781_vm9 = vcmask 1046528   ;;  %s1109_s16 = sshll.u32 %s1626_s28, 4 }
  0x48   : > { %v459_v11 = vld [vmem:[#allocation5 + $0x20] sm:$0xff]  ;;  %v458_v12 = vld [vmem:[#allocation5 + $0x18] sm:$0xff]  ;;  %v457_v13 = vld [vmem:[#allocation5 + $0x10] sm:$0xff]  ;;  %s1119_s26 = sshll.u32 %s1528_s13, 4  ;;  %s444_s1 = scalar_lea.vmem [#allocation11], %s1109_s16 }
  0x49   : > { %477 = vmatpush.msra.mxu0 %v468_v2  ;;  %1122 = vmatpush.msra.mxu1 %v468_v2  ;;  %v456_v14 = vld [vmem:[#allocation5 + $0x8] sm:$0xff]  ;;  %v455_v15 = vld [vmem:[#allocation5] sm:$0xff]  ;;  %v449_v20 = vld [vmem:[%s1630_s25 + $0x10] sm:$0xff]  ;;  %s975_s18 = scalar_lea.hbm %s1876_s9, %s1119_s26  ;;  %s976_s22 = sshll.u32 %s444_s1, 4  ;;  %s977_s22 = int_to_ptr.vmem [resolvable:$true] %s976_s22 }
  0x4a   : > { %v447_v16 = vld [vmem:[%s1630_s25] sm:$0xff]  ;;  %v448_v18 = vld [vmem:[%s1630_s25 + $0x8] sm:$0xff]  ;;  %v453_v21 = vld [vmem:[%s1630_s25 + $0x30] sm:$0xff]  ;;  %s978_s21 = sshll.u32 %s975_s18, 4  ;;  %s964_s13 = scalar_lea.sflag [#allocation4], %s1626_s28  ;;  %s979_s21 = int_to_ptr.hbm [resolvable:$true] %s978_s21 }
  0x4b   : > { %478 = vmatpush.msra.mxu0 %v467_v3  ;;  %1123 = vmatpush.msra.mxu1 %v467_v3  ;;  %v451_v17 = vld [vmem:[%s1630_s25 + $0x20] sm:$0xff]  ;;  %v452_v19 = vld [vmem:[%s1630_s25 + $0x28] sm:$0xff]  ;;  %v450_v22 = vld [vmem:[%s1630_s25 + $0x18] sm:$0xff]  ;;  %s1387_s5 = scalar_lea.hbm %s1876_s9, 32 }
  0x4c   : > { %v454_v23 = vld [vmem:[%s1630_s25 + $0x38] sm:$0xff]  ;;  %v804_v25 = vld [vmem:[#allocation7 + $0x70] sm:$0xff]  ;;  %v803_v26 = vld [vmem:[#allocation7 + $0x68] sm:$0xff]  ;;  %s1381_s25 = sshra.s32 %s979_s21, 4  ;;  %s1382_s25 = int_to_ptr.hbm [resolvable:$true] %s1381_s25 }
  0x4d   : > { %479 = vmatpush.msra.mxu0 %v466_v4  ;;  %1124 = vmatpush.msra.mxu1 %v466_v4  ;;  %v805_v24 = vld [vmem:[#allocation7 + $0x78] sm:$0xff]  ;;  %v802_v27 = vld [vmem:[#allocation7 + $0x60] sm:$0xff]  ;;  %v800_v29 = vld [vmem:[#allocation7 + $0x50] sm:$0xff]  ;;  %s1383_s19 = scalar_lea.hbm %s1382_s25, 16  ;;  %p1388_p6 = scmp.lt.s32.totalorder %s1382_s25, %s1876_s9 }
  0x4e   : > { %v801_v28 = vld [vmem:[#allocation7 + $0x58] sm:$0xff]  ;;  %v799_v30 = vld [vmem:[#allocation7 + $0x48] sm:$0xff]  ;;  %v1655_v31 = vld [vmem:[%s1869_s2] ss:$0 sm:$0xff]  ;;  %p1384_p3 = scmp.ne.s32.totalorder %s1382_s25, %s1383_s19  ;;  %p1389_p7 = scmp.lt.s32.totalorder %s1387_s5, %s1383_s19 }
  0x4f   : > { %480 = vmatpush.msra.mxu0 %v465_v5  ;;  %1125 = vmatpush.msra.mxu1 %v465_v5  ;;  %v798_v38 = vld [vmem:[#allocation7 + $0x40] sm:$0xff]  ;;  %v797_v47 = vld [vmem:[#allocation7 + $0x38] sm:$0xff]  ;;  %v796_v58 = vld [vmem:[#allocation7 + $0x30] sm:$0xff] }
  0x50   : > { %v795_v3 = vld [vmem:[#allocation7 + $0x28] sm:$0xff]  ;;  %p1385_p4 = pnand %p1384_p3, %p1559_p11  ;;  %p1390_p8 = por %p1389_p7, %p1388_p6 }
  0x51   : > { %481 = vmatpush.msra.mxu0 %v464_v6  ;;  %1126 = vmatpush.msra.mxu1 %v464_v6 }
  0x52   : > { %p1386_p5 = pneg %p1385_p4 }
  0x53   : > { %482 = vmatpush.msra.mxu0 %v463_v7  ;;  %1127 = vmatpush.msra.mxu1 %v463_v7 }
  0x54   : > { %p1391_p9 = pnand %p1390_p8, %p1386_p5 }
  0x55   : > { %483 = vmatpush.msra.mxu0 %v462_v8  ;;  %1128 = vmatpush.msra.mxu1 %v462_v8 }
  0x57   : > { %484 = vmatpush.msra.mxu0 %v461_v9  ;;  %1129 = vmatpush.msra.mxu1 %v461_v9 }
  0x59   : > { %485 = vmatpush.msra.mxu0 %v460_v10  ;;  %1130 = vmatpush.msra.mxu1 %v460_v10 }
  0x5b   : > { %486 = vmatpush.msra.mxu0 %v459_v11  ;;  %1131 = vmatpush.msra.mxu1 %v459_v11 }
  0x5d   : > { %487 = vmatpush.msra.mxu0 %v458_v12  ;;  %1132 = vmatpush.msra.mxu1 %v458_v12 }
  0x5f   : > { %488 = vmatpush.msra.mxu0 %v457_v13  ;;  %1133 = vmatpush.msra.mxu1 %v457_v13 }
  0x61   : > { %489 = vmatpush.msra.mxu0 %v456_v14  ;;  %1134 = vmatpush.msra.mxu1 %v456_v14 }
  0x63   : > { %490 = vmatpush.msra.mxu0 %v455_v15  ;;  %1135 = vmatpush.msra.mxu1 %v455_v15 }
  0x64   : > { %491 = vmatmul.f32.vlgmr.msra.gmra.mxu0 %v447_v16  ;;  %503 = vmatmul.f32.vlgmr.msra.gmra.mxu1 %v451_v17 }
  0x65   : > { %810 = vmatpush.msrb.mxu1 %v805_v24 }
  0x67   : > { %811 = vmatpush.msrb.mxu1 %v804_v25 }
  0x69   : > { %812 = vmatpush.msrb.mxu1 %v803_v26 }
  0x6b   : > { %813 = vmatpush.msrb.mxu1 %v802_v27 }
  0x6c   : > { %494 = vmatmul.f32.gmra.mxu0 %v448_v18  ;;  %506 = vmatmul.f32.gmra.mxu1 %v452_v19 }
  0x6d   : > { %814 = vmatpush.msrb.mxu1 %v801_v28 }
  0x6f   : > { %815 = vmatpush.msrb.mxu1 %v800_v29 }
  0x71   : > { %816 = vmatpush.msrb.mxu1 %v799_v30 }
  0x73   : > { %817 = vmatpush.msrb.mxu1 %v798_v38 }
  0x74   : > { %497 = vmatmul.f32.gmra.mxu0 %v449_v20  ;;  %509 = vmatmul.f32.gmra.mxu1 %v453_v21 }
  0x75   : > { %818 = vmatpush.msrb.mxu1 %v797_v47 }
  0x77   : > { %819 = vmatpush.msrb.mxu1 %v796_v58 }
  0x79   : > { %820 = vmatpush.msrb.mxu1 %v795_v3 }
  0x7c   : > { %500 = vmatmul.f32.gmra.mxu0 %v450_v22  ;;  %512 = vmatmul.f32.gmra.mxu1 %v454_v23 }
  0xe1   : > { %v492_v32 = vpop.f32.mrf.mxu0  ;;  %v504_v33 = vpop.f32.mrf.mxu1 }
  0xe2   : > { %v493_v34 = vadd.f32 %v1655_v31, %v492_v32  ;;  %v505_v35 = vadd.f32 %v1655_v31, %v504_v33 }
  0xe4   : > { %v516_v36 = vmax.f32 %v493_v34, 0.0  ;;  %v520_v37 = vmax.f32 %v505_v35, 0.0 }
  0xe6   : > { %v525_v39 = vsel %vm524_vm0, %v516_v36, -inf  ;;  %v554_v40 = vsel %vm553_vm1, %v516_v36, -inf  ;;  %v583_v41 = vsel %vm582_vm2, %v516_v36, -inf  ;;  %v612_v42 = vsel %vm611_vm3, %v516_v36, -inf }
  0xe7   : > { %v526_v43 = vrot.slane %v525_v39, 4  ;;  %v555_v44 = vrot.slane %v554_v40, 4  ;;  %v584_v45 = vrot.slane %v583_v41, 4  ;;  %v613_v46 = vrot.slane %v612_v42, 4 }
  0xe8   : > { %v539_v48 = vsel %vm524_vm0, %v520_v37, -inf  ;;  %v568_v49 = vsel %vm553_vm1, %v520_v37, -inf  ;;  %v597_v50 = vsel %vm582_vm2, %v520_v37, -inf  ;;  %v626_v51 = vsel %vm611_vm3, %v520_v37, -inf }
  0xe9   : > { %v527_v52 = vmax.f32 %v525_v39, %v526_v43  ;;  %v556_v53 = vmax.f32 %v554_v40, %v555_v44  ;;  %v585_v54 = vmax.f32 %v583_v41, %v584_v45  ;;  %v614_v55 = vmax.f32 %v612_v42, %v613_v46  ;;  %v495_v56 = vpop.f32.mrf.mxu0  ;;  %v507_v57 = vpop.f32.mrf.mxu1  ;;  %v794_v39 = vld [vmem:[#allocation7 + $0x20] sm:$0xff] }
  0xea   : > { %v540_v59 = vrot.slane %v539_v48, 4  ;;  %v569_v60 = vrot.slane %v568_v49, 4  ;;  %v598_v61 = vrot.slane %v597_v50, 4  ;;  %v627_v62 = vrot.slane %v626_v51, 4  ;;  %821 = vmatpush.msrb.mxu1 %v794_v39 }
  0xeb   : > { %v528_v63 = vrot.slane %v527_v52, 2  ;;  %v557_v0 = vrot.slane %v556_v53, 2  ;;  %v586_v1 = vrot.slane %v585_v54, 2  ;;  %v615_v2 = vrot.slane %v614_v55, 2 }
  0xec   : > { %v541_v4 = vmax.f32 %v539_v48, %v540_v59  ;;  %v570_v5 = vmax.f32 %v568_v49, %v569_v60  ;;  %v599_v6 = vmax.f32 %v597_v50, %v598_v61  ;;  %v628_v7 = vmax.f32 %v626_v51, %v627_v62  ;;  %v793_v48 = vld [vmem:[#allocation7 + $0x18] sm:$0xff] }
  0xed   : > { %v529_v8 = vmax.f32 %v527_v52, %v528_v63  ;;  %v558_v9 = vmax.f32 %v556_v53, %v557_v0  ;;  %v587_v10 = vmax.f32 %v585_v54, %v586_v1  ;;  %v616_v11 = vmax.f32 %v614_v55, %v615_v2  ;;  %822 = vmatpush.msrb.mxu1 %v793_v48  ;;  %v791_v2 = vld [vmem:[#allocation7 + $0x8] sm:$0xff] }
  0xee   : > { %v542_v12 = vrot.slane %v541_v4, 2  ;;  %v571_v13 = vrot.slane %v570_v5, 2  ;;  %v600_v14 = vrot.slane %v599_v6, 2  ;;  %v629_v15 = vrot.slane %v628_v7, 2 }
  0xef   : > { %v530_v16 = vrot.slane %v529_v8, 1  ;;  %v559_v17 = vrot.slane %v558_v9, 1  ;;  %v588_v18 = vrot.slane %v587_v10, 1  ;;  %v617_v19 = vrot.slane %v616_v11, 1 }
  0xf0   : > { %v543_v20 = vmax.f32 %v541_v4, %v542_v12  ;;  %v572_v21 = vmax.f32 %v570_v5, %v571_v13  ;;  %v601_v22 = vmax.f32 %v599_v6, %v600_v14  ;;  %v630_v23 = vmax.f32 %v628_v7, %v629_v15 }
  0xf1   : > { %v531_v24 = vmax.f32 %v529_v8, %v530_v16  ;;  %v560_v25 = vmax.f32 %v558_v9, %v559_v17  ;;  %v498_v26 = vpop.f32.mrf.mxu0  ;;  %v496_v32 = vadd.f32 %v1655_v31, %v495_v56  ;;  %v508_v33 = vadd.f32 %v1655_v31, %v507_v57  ;;  %v510_v35 = vpop.f32.mrf.mxu1  ;;  %v792_v57 = vld [vmem:[#allocation7 + $0x10] sm:$0xff] }
  0xf2   : > { %v544_v27 = vrot.slane %v543_v20, 1  ;;  %v573_v28 = vrot.slane %v572_v21, 1  ;;  %v602_v29 = vrot.slane %v601_v22, 1  ;;  %v631_v30 = vrot.slane %v630_v23, 1  ;;  %823 = vmatpush.msrb.mxu1 %v792_v57 }
  0xf3   : > { %v499_v34 = vadd.f32 %v1655_v31, %v498_v26  ;;  %v1670_v36 = vmax.f32 %v587_v10, %v588_v18  ;;  %v1672_v37 = vmax.f32 %v616_v11, %v617_v19  ;;  %v1675_v38 = vsel %vm752_vm4, %v531_v24, %v560_v25  ;;  %v790_v11 = vld [vmem:[#allocation7] sm:$0xff] }
  0xf4   : > { %v545_v40 = vmax.f32 %v543_v20, %v544_v27  ;;  %v574_v41 = vmax.f32 %v572_v21, %v573_v28  ;;  %v517_v42 = vmax.f32 %v496_v32, 0.0  ;;  %v521_v43 = vmax.f32 %v508_v33, 0.0  ;;  %824 = vmatpush.msrb.mxu1 %v791_v2 }
  0xf5   : > { %v1677_v44 = vmax.f32 %v601_v22, %v602_v29  ;;  %v1679_v45 = vmax.f32 %v630_v23, %v631_v30  ;;  %v1681_v46 = vmax.f32 %v499_v34, 0.0  ;;  %v1684_v47 = vadd.f32 %v1655_v31, %v510_v35 }
  0xf6   : > { %v640_v49 = vsel %vm524_vm0, %v517_v42, -inf  ;;  %v668_v50 = vsel %vm553_vm1, %v517_v42, -inf  ;;  %v696_v51 = vsel %vm582_vm2, %v517_v42, -inf  ;;  %v724_v52 = vsel %vm611_vm3, %v517_v42, -inf  ;;  %825 = vmatpush.msrb.mxu1 %v790_v11 }
  0xf7   : > { %v641_v53 = vrot.slane %v640_v49, 4  ;;  %v669_v54 = vrot.slane %v668_v50, 4  ;;  %v697_v55 = vrot.slane %v696_v51, 4  ;;  %v725_v56 = vrot.slane %v724_v52, 4 }
  0xf8   : > { %v654_v58 = vsel %vm524_vm0, %v521_v43, -inf  ;;  %v682_v59 = vsel %vm553_vm1, %v521_v43, -inf  ;;  %v710_v60 = vsel %vm582_vm2, %v521_v43, -inf  ;;  %v738_v61 = vsel %vm611_vm3, %v521_v43, -inf }
  0xf9   : > { %v642_v62 = vmax.f32 %v640_v49, %v641_v53  ;;  %v670_v63 = vmax.f32 %v668_v50, %v669_v54  ;;  %v698_v0 = vmax.f32 %v696_v51, %v697_v55  ;;  %v1694_v1 = vmax.f32 %v724_v52, %v725_v56  ;;  %v501_v48 = vpop.f32.mrf.mxu0 }
  0xfa   : > { %v655_v3 = vrot.slane %v654_v58, 4  ;;  %v683_v4 = vrot.slane %v682_v59, 4  ;;  %v711_v5 = vrot.slane %v710_v60, 4  ;;  %v739_v6 = vrot.slane %v738_v61, 4 }
  0xfb   : > { %v1697_v7 = vsel %vm752_vm4, %v545_v40, %v574_v41  ;;  %v643_v8 = vrot.slane %v642_v62, 2  ;;  %v671_v9 = vrot.slane %v670_v63, 2  ;;  %v699_v10 = vrot.slane %v698_v0, 2 }
  0xfc   : > { %v656_v12 = vmax.f32 %v654_v58, %v655_v3  ;;  %v684_v13 = vmax.f32 %v682_v59, %v683_v4  ;;  %v712_v14 = vmax.f32 %v710_v60, %v711_v5  ;;  %v1699_v15 = vmax.f32 %v738_v61, %v739_v6 }
  0xfd   : > { %v644_v16 = vmax.f32 %v642_v62, %v643_v8  ;;  %v672_v17 = vmax.f32 %v670_v63, %v671_v9  ;;  %v1701_v18 = vmax.f32 %v698_v0, %v699_v10  ;;  %v532_v19 = vsel %vm524_vm0, %v1681_v46, -inf }
  0xfe   : > { %v727_v20 = vrot.slane %v1694_v1, 2  ;;  %v657_v21 = vrot.slane %v656_v12, 2  ;;  %v685_v22 = vrot.slane %v684_v13, 2  ;;  %v713_v23 = vrot.slane %v712_v14, 2 }
  0xff   : > { %v645_v24 = vrot.slane %v644_v16, 1  ;;  %v673_v25 = vrot.slane %v672_v17, 1  ;;  %v741_v26 = vrot.slane %v1699_v15, 2  ;;  %v533_v27 = vrot.slane %v532_v19, 4 }
 0x100   : > { %v658_v28 = vmax.f32 %v656_v12, %v657_v21  ;;  %v686_v29 = vmax.f32 %v684_v13, %v685_v22  ;;  %v1707_v30 = vmax.f32 %v712_v14, %v713_v23  ;;  %v561_v32 = vsel %vm553_vm1, %v1681_v46, -inf }
 0x101   : > { %v1711_v33 = vmax.f32 %v644_v16, %v645_v24  ;;  %v701_v34 = vrot.slane %v1701_v18, 1  ;;  %v534_v35 = vmax.f32 %v532_v19, %v533_v27  ;;  %v562_v39 = vrot.slane %v561_v32, 4 }
 0x102   : > { %v1714_v40 = vmax.f32 %v672_v17, %v673_v25  ;;  %v659_v41 = vrot.slane %v658_v28, 1  ;;  %v687_v42 = vrot.slane %v686_v29, 1  ;;  %v590_v43 = vsel %vm582_vm2, %v1681_v46, -inf }
 0x103   : > { %v535_v49 = vrot.slane %v534_v35, 2  ;;  %v563_v50 = vmax.f32 %v561_v32, %v562_v39  ;;  %v591_v51 = vrot.slane %v590_v43, 4  ;;  %v619_v52 = vsel %vm611_vm3, %v1681_v46, -inf }
 0x104   : > { %v1720_v53 = vmax.f32 %v658_v28, %v659_v41  ;;  %v715_v54 = vrot.slane %v1707_v30, 1  ;;  %v620_v55 = vrot.slane %v619_v52, 4  ;;  %v522_v56 = vmax.f32 %v1684_v47, 0.0 }
 0x105   : > { %v536_v57 = vmax.f32 %v534_v35, %v535_v49  ;;  %v564_v58 = vrot.slane %v563_v50, 2  ;;  %v592_v59 = vmax.f32 %v590_v43, %v591_v51  ;;  %v502_v60 = vadd.f32 %v1655_v31, %v501_v48 }
 0x106   : > { %v621_v61 = vmax.f32 %v619_v52, %v620_v55  ;;  %v546_v62 = vsel %vm524_vm0, %v522_v56, -inf  ;;  %v575_v63 = vsel %vm553_vm1, %v522_v56, -inf  ;;  %v604_v0 = vsel %vm582_vm2, %v522_v56, -inf }
 0x107   : > { %v537_v46 = vrot.slane %v536_v57, 1  ;;  %v565_v2 = vmax.f32 %v563_v50, %v564_v58  ;;  %v593_v3 = vrot.slane %v592_v59, 2  ;;  %v547_v4 = vrot.slane %v546_v62, 4 }
 0x108   : > { %v622_v5 = vrot.slane %v621_v61, 2  ;;  %v576_v6 = vrot.slane %v575_v63, 4  ;;  %v605_v8 = vrot.slane %v604_v0, 4  ;;  %v633_v47 = vsel %vm611_vm3, %v522_v56, -inf }
 0x109   : > { %v1729_v9 = vmax.f32 %v686_v29, %v687_v42  ;;  %v566_v10 = vrot.slane %v565_v2, 1  ;;  %v594_v11 = vmax.f32 %v592_v59, %v593_v3  ;;  %v548_v12 = vmax.f32 %v546_v62, %v547_v4  ;;  %v513_v59 = vpop.f32.mrf.mxu1 }
 0x10a   : > { %v623_v13 = vmax.f32 %v621_v61, %v622_v5  ;;  %v577_v14 = vmax.f32 %v575_v63, %v576_v6  ;;  %v606_v16 = vmax.f32 %v604_v0, %v605_v8  ;;  %v634_v17 = vrot.slane %v633_v47, 4  ;;  %v849_v61 = vld [vmem:[#allocation8 + $0x70] sm:$0xff]  ;;  %v848_v6 = vld [vmem:[#allocation8 + $0x68] sm:$0xff] }
 0x10b   : > { %v1731_v19 = vmax.f32 %v536_v57, %v537_v46  ;;  %v595_v21 = vrot.slane %v594_v11, 1  ;;  %v549_v22 = vrot.slane %v548_v12, 2  ;;  %v519_v23 = vmax.f32 %v502_v60, 0.0  ;;  %v850_v60 = vld [vmem:[#allocation8 + $0x78] sm:$0xff] }
 0x10c   : > { %v1733_v24 = vmax.f32 %v565_v2, %v566_v10  ;;  %v578_v25 = vrot.slane %v577_v14, 2  ;;  %v607_v27 = vrot.slane %v606_v16, 2  ;;  %v635_v28 = vmax.f32 %v633_v47, %v634_v17  ;;  %855 = vmatpush.msra.mxu2 %v850_v60  ;;  %v847_v17 = vld [vmem:[#allocation8 + $0x60] sm:$0xff] }
 0x10d   : > { %v624_v32 = vrot.slane %v623_v13, 1  ;;  %v550_v29 = vmax.f32 %v548_v12, %v549_v22  ;;  %v647_v35 = vsel %vm524_vm0, %v519_v23, -inf  ;;  %v675_v39 = vsel %vm553_vm1, %v519_v23, -inf }
 0x10e   : > { %v1737_v41 = vmax.f32 %v594_v11, %v595_v21  ;;  %v579_v42 = vmax.f32 %v577_v14, %v578_v25  ;;  %v608_v43 = vmax.f32 %v606_v16, %v607_v27  ;;  %v636_v48 = vrot.slane %v635_v28, 2  ;;  %856 = vmatpush.msra.mxu2 %v849_v61 }
 0x10f   : > { %v551_v49 = vrot.slane %v550_v29, 1  ;;  %v648_v50 = vrot.slane %v647_v35, 4  ;;  %v676_v51 = vrot.slane %v675_v39, 4  ;;  %v703_v52 = vsel %vm582_vm2, %v519_v23, -inf }
 0x110   : > { %v580_v55 = vrot.slane %v579_v42, 1  ;;  %v609_v56 = vrot.slane %v608_v43, 1  ;;  %v637_v57 = vmax.f32 %v635_v28, %v636_v48  ;;  %v704_v58 = vrot.slane %v703_v52, 4  ;;  %857 = vmatpush.msra.mxu2 %v848_v6  ;;  %v846_v28 = vld [vmem:[#allocation8 + $0x58] sm:$0xff] }
 0x111   : > { %v1740_v62 = vmax.f32 %v623_v13, %v624_v32  ;;  %v649_v63 = vmax.f32 %v647_v35, %v648_v50  ;;  %v677_v0 = vmax.f32 %v675_v39, %v676_v51  ;;  %v731_v46 = vsel %vm611_vm3, %v519_v23, -inf  ;;  %v844_v50 = vld [vmem:[#allocation8 + $0x48] sm:$0xff] }
 0x112   : > { %v1743_v2 = vmax.f32 %v550_v29, %v551_v49  ;;  %v1745_v3 = vmax.f32 %v579_v42, %v580_v55  ;;  %v638_v4 = vrot.slane %v637_v57, 1  ;;  %v1747_v5 = vmax.f32 %v703_v52, %v704_v58  ;;  %858 = vmatpush.msra.mxu2 %v847_v17 }
 0x113   : > { %v650_v8 = vrot.slane %v649_v63, 2  ;;  %v678_v47 = vrot.slane %v677_v0, 2  ;;  %v732_v10 = vrot.slane %v731_v46, 4  ;;  %v514_v11 = vadd.f32 %v1655_v31, %v513_v59  ;;  %v843_v59 = vld [vmem:[#allocation8 + $0x40] sm:$0xff] }
 0x114   : > { %v1750_v12 = vmax.f32 %v608_v43, %v609_v56  ;;  %v1752_v13 = vmax.f32 %v637_v57, %v638_v4  ;;  %v706_v14 = vrot.slane %v1747_v5, 2  ;;  %v702_v16 = vmax.f32 %v1701_v18, %v701_v34  ;;  %859 = vmatpush.msra.mxu2 %v846_v28 }
 0x115   : > { %v651_v21 = vmax.f32 %v649_v63, %v650_v8  ;;  %v1758_v22 = vmax.f32 %v677_v0, %v678_v47  ;;  %v523_v23 = vmax.f32 %v514_v11, 0.0  ;;  %v716_v31 = vmax.f32 %v1707_v30, %v715_v54  ;;  %v842_v0 = vld [vmem:[#allocation8 + $0x38] sm:$0xff]  ;;  %v841_v11 = vld [vmem:[#allocation8 + $0x30] sm:$0xff] }
 0x116   : > { %v1763_v25 = vmax.f32 %v731_v46, %v732_v10  ;;  %v728_v27 = vmax.f32 %v1694_v1, %v727_v20  ;;  %v742_v18 = vmax.f32 %v1699_v15, %v741_v26  ;;  %v757_v34 = vsel %vm524_vm0, %v1675_v38, %v1670_v36  ;;  %v845_v26 = vld [vmem:[#allocation8 + $0x50] sm:$0xff] }
 0x117   : > { %v661_v32 = vsel %vm524_vm0, %v523_v23, -inf  ;;  %v689_v30 = vsel %vm553_vm1, %v523_v23, -inf  ;;  %v717_v54 = vsel %vm582_vm2, %v523_v23, -inf  ;;  %v759_v29 = vsel %vm524_vm0, %v1697_v7, %v1677_v44  ;;  %860 = vmatpush.msra.mxu2 %v845_v26 }
 0x118   : > { %v662_v1 = vrot.slane %v661_v32, 4  ;;  %v690_v20 = vrot.slane %v689_v30, 4  ;;  %v718_v35 = vrot.slane %v717_v54, 4  ;;  %v745_v15 = vsel %vm611_vm3, %v523_v23, -inf }
 0x119   : > { %v652_v39 = vrot.slane %v651_v21, 1  ;;  %v746_v36 = vrot.slane %v745_v15, 4  ;;  %v729_v38 = vrot.slane %v728_v27, 1  ;;  %v743_v42 = vrot.slane %v742_v18, 1  ;;  %861 = vmatpush.msra.mxu2 %v844_v50  ;;  %v837_v50 = vld [vmem:[#allocation8 + $0x10] sm:$0xff] }
 0x11a   : > { %v663_v43 = vmax.f32 %v661_v32, %v662_v1  ;;  %v691_v48 = vmax.f32 %v689_v30, %v690_v20  ;;  %v719_v49 = vmax.f32 %v717_v54, %v718_v35  ;;  %v762_v7 = vsel %vm761_vm5, %v757_v34, %v1672_v37  ;;  %v839_v54 = vld [vmem:[#allocation8 + $0x20] sm:$0xff] }
 0x11b   : > { %v747_v51 = vmax.f32 %v745_v15, %v746_v36  ;;  %v730_v52 = vmax.f32 %v728_v27, %v729_v38  ;;  %v744_v44 = vmax.f32 %v742_v18, %v743_v42  ;;  %v764_v58 = vsel %vm761_vm5, %v759_v29, %v1679_v45  ;;  %862 = vmatpush.msra.mxu2 %v843_v59  ;;  %v889_v59 = vld [vmem:[#allocation10 + $0x48] sm:$0xff] }
 0x11c   : > { %v664_v55 = vrot.slane %v663_v43, 2  ;;  %v692_v56 = vrot.slane %v691_v48, 2  ;;  %v720_v57 = vrot.slane %v719_v49, 2  ;;  %v767_v63 = vsel %vm766_vm6, %v762_v7, %v1711_v33  ;;  %v894_v7 = vld [vmem:[#allocation10 + $0x70] sm:$0xff] }
 0x11d   : > { %v769_v37 = vsel %vm766_vm6, %v764_v58, %v1720_v53  ;;  %v772_v46 = vsel %vm771_vm7, %v767_v63, %v1714_v40  ;;  %v680_v4 = vrot.slane %v1758_v22, 1  ;;  %v707_v6 = vmax.f32 %v1747_v5, %v706_v14  ;;  %863 = vmatpush.msra.mxu2 %v842_v0  ;;  %v840_v14 = vld [vmem:[#allocation8 + $0x28] sm:$0xff]  ;;  %v890_v58 = vld [vmem:[#allocation10 + $0x50] sm:$0xff]  ;;  %v887_v63 = vld [vmem:[#allocation10 + $0x38] sm:$0xff] }
 0x11e   : > { %v665_v60 = vmax.f32 %v663_v43, %v664_v55  ;;  %v693_v61 = vmax.f32 %v691_v48, %v692_v56  ;;  %v774_v45 = vsel %vm771_vm7, %v769_v37, %v1729_v9  ;;  %v777_v47 = vsel %vm776_vm8, %v772_v46, %v702_v16  ;;  %v893_v55 = vld [vmem:[#allocation10 + $0x68] sm:$0xff]  ;;  %v892_v56 = vld [vmem:[#allocation10 + $0x60] sm:$0xff]  ;;  %v886_v37 = vld [vmem:[#allocation10 + $0x30] sm:$0xff] }
 0x11f   : > { %v779_v33 = vsel %vm776_vm8, %v774_v45, %v716_v31  ;;  %v653_v53 = vmax.f32 %v651_v21, %v652_v39  ;;  %v782_v17 = vsel %vm781_vm9, %v777_v47, %v730_v52  ;;  %v681_v23 = vmax.f32 %v1758_v22, %v680_v4  ;;  %864 = vmatpush.msra.mxu2 %v841_v11  ;;  %v835_v52 = vld [vmem:[#allocation8] sm:$0xff]  ;;  %v885_v45 = vld [vmem:[#allocation10 + $0x28] sm:$0xff]  ;;  %v882_v11 = vld [vmem:[#allocation10 + $0x10] sm:$0xff] }
 0x120   : > { %v666_v8 = vrot.slane %v665_v60, 1  ;;  %v694_v10 = vrot.slane %v693_v61, 1  ;;  %v784_v40 = vsel %vm781_vm9, %v779_v33, %v744_v44  ;;  %v708_v18 = vrot.slane %v707_v6, 1  ;;  %v895_v44 = vld [vmem:[#allocation10 + $0x78] sm:$0xff] }
 0x121   : > { %v786_v27 = vsub.f32 %v782_v17, %v784_v40  ;;  %v721_v5 = vmax.f32 %v719_v49, %v720_v57  ;;  %v734_v16 = vrot.slane %v1763_v25, 2  ;;  %v748_v28 = vrot.slane %v747_v51, 2  ;;  %865 = vmatpush.msra.mxu2 %v840_v14  ;;  %900 = vmatpush.msra.mxu3 %v895_v44  ;;  %v891_v57 = vld [vmem:[#allocation10 + $0x58] sm:$0xff]  ;;  %v880_v17 = vld [vmem:[#allocation10] sm:$0xff] }
 0x122   : > { %v667_v9 = vmax.f32 %v665_v60, %v666_v8  ;;  %v695_v34 = vmax.f32 %v693_v61, %v694_v10  ;;  %v754_v21 = vsel %vm752_vm4, %v1731_v19, %v1733_v24  ;;  %v756_v22 = vsel %vm752_vm4, %v1743_v2, %v1745_v3  ;;  %v888_v60 = vld [vmem:[#allocation10 + $0x40] sm:$0xff]  ;;  %v883_v8 = vld [vmem:[#allocation10 + $0x18] sm:$0xff] }
 0x123   : > { %v788_v31 = vand.u32 2147483647, %v786_v27  ;;  %v722_v32 = vrot.slane %v721_v5, 1  ;;  %v758_v30 = vsel %vm524_vm0, %v754_v21, %v1737_v41  ;;  %v735_v29 = vmax.f32 %v1763_v25, %v734_v16  ;;  %v838_v41 = vld [vmem:[#allocation8 + $0x18] sm:$0xff]  ;;  %866 = vmatpush.msra.mxu2 %v839_v54  ;;  %901 = vmatpush.msra.mxu3 %v894_v7  ;;  %v1236_v61 = vld [vmem:[%s1871_s4] ss:$0 sm:$0xff] }
 0x124   : > { %v749_v1 = vmax.f32 %v747_v51, %v748_v28  ;;  %v760_v20 = vsel %vm524_vm0, %v756_v22, %v1750_v12  ;;  %v763_v19 = vsel %vm761_vm5, %v758_v30, %v1740_v62  ;;  %v709_v24 = vmax.f32 %v707_v6, %v708_v18  ;;  %v836_v51 = vld [vmem:[#allocation8 + $0x8] sm:$0xff]  ;;  %v884_v6 = vld [vmem:[#allocation10 + $0x20] sm:$0xff] }
 0x125   : > { %826 = vmatmul.f32.vlgmr.msrb.gmra.mxu1 %v788_v31  ;;  %v723_v35 = vmax.f32 %v721_v5, %v722_v32  ;;  %v765_v2 = vsel %vm761_vm5, %v760_v20, %v1752_v13  ;;  %v768_v3 = vsel %vm766_vm6, %v763_v19, %v653_v53  ;;  %v736_v15 = vrot.slane %v735_v29, 1  ;;  %867 = vmatpush.msra.mxu2 %v838_v41  ;;  %v881_v53 = vld [vmem:[#allocation10 + $0x8] sm:$0xff]  ;;  %v1237_v40 = vld [vmem:[%s1873_s6] ss:$0 sm:$0xff] }
 0x126   : > { %v750_v26 = vrot.slane %v749_v1, 1  ;;  %v770_v25 = vsel %vm766_vm6, %v765_v2, %v667_v9  ;;  %v773_v39 = vsel %vm771_vm7, %v768_v3, %v681_v23  ;;  %902 = vmatpush.msra.mxu3 %v893_v55 }
 0x127   : > { %v775_v12 = vsel %vm771_vm7, %v770_v25, %v695_v34  ;;  %v778_v62 = vsel %vm776_vm8, %v773_v39, %v709_v24  ;;  %v737_v36 = vmax.f32 %v735_v29, %v736_v15  ;;  %868 = vmatpush.msra.mxu2 %v837_v50  ;;  %v1238_v34 = vld [vmem:[%s1875_s8] ss:$0 sm:$0xff] }
 0x128   : > { %v751_v38 = vmax.f32 %v749_v1, %v750_v26  ;;  %v780_v42 = vsel %vm776_vm8, %v775_v12, %v723_v35  ;;  %903 = vmatpush.msra.mxu3 %v892_v56 }
 0x129   : > { %v783_v13 = vsel %vm781_vm9, %v778_v62, %v737_v36  ;;  %869 = vmatpush.msra.mxu2 %v836_v51 }
 0x12a   : > { %v785_v43 = vsel %vm781_vm9, %v780_v42, %v751_v38  ;;  %904 = vmatpush.msra.mxu3 %v891_v57 }
 0x12b   : > { %v787_v48 = vsub.f32 %v783_v13, %v785_v43  ;;  %870 = vmatpush.msra.mxu2 %v835_v52 }
 0x12c   : > { %905 = vmatpush.msra.mxu3 %v890_v58 }
 0x12d   : > { %v789_v49 = vand.u32 2147483647, %v787_v48 }
 0x12e   : > { %906 = vmatpush.msra.mxu3 %v889_v59 }
 0x12f   : > { %829 = vmatmul.f32.gmra.mxu1 %v789_v49 }
 0x130   : > { %907 = vmatpush.msra.mxu3 %v888_v60 }
 0x132   : > { %908 = vmatpush.msra.mxu3 %v887_v63 }
 0x134   : > { %909 = vmatpush.msra.mxu3 %v886_v37 }
 0x136   : > { %910 = vmatpush.msra.mxu3 %v885_v45 }
 0x138   : > { %911 = vmatpush.msra.mxu3 %v884_v6 }
 0x13a   : > { %912 = vmatpush.msra.mxu3 %v883_v8 }
 0x13c   : > { %913 = vmatpush.msra.mxu3 %v882_v11 }
 0x13e   : > { %914 = vmatpush.msra.mxu3 %v881_v53 }
 0x140   : > { %915 = vmatpush.msra.mxu3 %v880_v17 }
 0x1a2   : > { %v827_v0 = vpop.f32.mrf.mxu1 }
 0x1a3   : > { %v828_v46 = vadd.f32 %v1236_v61, %v827_v0 }
 0x1a5   : > { %v833_v4 = vmax.f32 %v828_v46, 0.0 }
 0x1a7   : > { %871 = vmatmul.f32.vlgmr.msra.gmra.mxu2 %v833_v4 }
 0x1ac   : > { %v830_v47 = vpop.f32.mrf.mxu1 }
 0x1ad   : > { %v831_v33 = vadd.f32 %v1236_v61, %v830_v47 }
 0x1af   : > { %v834_v10 = vmax.f32 %v831_v33, 0.0 }
 0x1b1   : > { %874 = vmatmul.f32.gmra.mxu2 %v834_v10 }
 0x22a   : > { %v872_v23 = vpop.f32.mrf.mxu2 }
 0x22b   : > { %v873_v9 = vadd.f32 %v1237_v40, %v872_v23 }
 0x22d   : > { %v878_v27 = vmax.f32 %v873_v9, 0.0 }
 0x22f   : > { %916 = vmatmul.f32.vlgmr.msra.gmra.mxu3 %v878_v27 }
 0x234   : > { %v875_v18 = vpop.f32.mrf.mxu2 }
 0x235   : > { %v876_v5 = vadd.f32 %v1237_v40, %v875_v18 }
 0x237   : > { %v879_v14 = vmax.f32 %v876_v5, 0.0 }
 0x239   : > { %919 = vmatmul.f32.gmra.mxu3 %v879_v14 }
 0x2b2   : > { %v917_v16 = vpop.f32.mrf.mxu3 }
 0x2b3   : > { %v918_v28 = vadd.f32 %v1238_v34, %v917_v16 }
 0x2b5   : > { %v1110_v21 = vmul.f32 -1.442695, %v918_v28 }
 0x2b7   : > { %1239 = vpow2.f32 %v1110_v21 }
 0x2bc   : > { %v920_v31 = vpop.f32.mrf.mxu3 }
 0x2bd   : > { %v1240_v32 = vpop.eup %1239  ;;  %v921_v22 = vadd.f32 %v1238_v34, %v920_v31 }
 0x2be   : > { %v929_v30 = vadd.f32 1.0, %v1240_v32 }
 0x2bf   : > { %v1111_v54 = vmul.f32 -1.442695, %v921_v22 }
 0x2c0   : > { %1241 = vrcp.f32 %v929_v30  ;;  %v942_v35 = vand.u32 2147483648, %v929_v30  ;;  %v940_v3 = vand.u32 2147483647, %v929_v30  ;;  %vm936_vm11 = vweird.f32 %v929_v30 }
 0x2c1   : > { %1243 = vpow2.f32 %v1111_v54 }
 0x2c2   : > { %v943_v15 = vor.u32 1.1754944e-38, %v942_v35  ;;  %vm941_vm13 = vcmp.eq.f32.partialorder %v940_v3, 8.507059e+37 }
 0x2c6   : > { %v1242_v29 = vpop.eup %1241 }
 0x2c7   : > { %v1244_v1 = vpop.eup %1243  ;;  %v932_v20 = vmul.f32 %v1242_v29, %v929_v30  ;;  %vm937_vm10 = vweird.f32 %v1242_v29 }
 0x2c8   : > { %v930_v19 = vadd.f32 1.0, %v1244_v1  ;;  %vm938_vm12 = vmor %vm936_vm11, %vm937_vm10 }
 0x2c9   : > { %v933_v24 = vsub.f32 1.0, %v932_v20 }
 0x2ca   : > { %1245 = vrcp.f32 %v930_v19  ;;  %v957_v36 = vand.u32 2147483648, %v930_v19  ;;  %v955_v42 = vand.u32 2147483647, %v930_v19  ;;  %vm951_vm15 = vweird.f32 %v930_v19 }
 0x2cb   : > { %v934_v2 = vmul.f32 %v1242_v29, %v933_v24 }
 0x2cc   : > { %v958_v43 = vor.u32 1.1754944e-38, %v957_v36  ;;  %vm956_vm1 = vcmp.eq.f32.partialorder %v955_v42, 8.507059e+37 }
 0x2cd   : > { %v935_v41 = vadd.f32 %v1242_v29, %v934_v2 }
 0x2cf   : > { %v939_v26 = vsel %vm938_vm12, %v1242_v29, %v935_v41 }
 0x2d0   : > { %v1246_v25 = vpop.eup %1245  ;;  %v944_v39 = vsel %vm941_vm13, %v943_v15, %v939_v26 }
 0x2d1   : > { %v947_v12 = vmul.f32 %v1246_v25, %v930_v19  ;;  %961 = vst [vmem:[%s444_s1] sm:$0xff] %v944_v39  ;;  %vm952_vm14 = vweird.f32 %v1246_v25 }
 0x2d2   : > { %vm953_vm0 = vmor %vm951_vm15, %vm952_vm14 }
 0x2d3   : > { %v948_v62 = vsub.f32 1.0, %v947_v12 }
 0x2d5   : > { %v949_v38 = vmul.f32 %v1246_v25, %v948_v62 }
 0x2d7   : > { %v950_v13 = vadd.f32 %v1246_v25, %v949_v38 }
 0x2d9   : > { %v954_v48 = vsel %vm953_vm0, %v1246_v25, %v950_v13 }
 0x2da   : > { %v959_v49 = vsel %vm956_vm1, %v958_v43, %v954_v48 }
 0x2db   : > { %962 = vst [vmem:[%s444_s1 + $0x8] sm:$0xff] %v959_v49 }
 0x2dc   : > { %1394 = shalt.err (!%p1391_p9)
}
 0x2dd   : > { %s1455_s28 = smov 128   ;;  %s1456_s27 = smov 8  }
 0x2de   : > { %1161 = dma.vmem_to_hbm [thread:$0]  (%p1559_p11), %s977_s22, 256, %s979_s21, %s964_s13, %s1455_s28, %s1455_s28, %s1456_s27  }
 0x2df PF: > { %s1899_s14 = sld [smem:[#allocation19_spill]]  ;;  %p1177_p10 = pnand %p1096_p2, %p1563_p12 }
 0x2e1   : > { %p1178_p13 = pneg %p1177_p10 }
 0x2e5   : > { %s993_s26 = sand.u32 1, %s1899_s14  }
 0x2e6   : > { %s994_s1 = scalar_lea.sflag [#allocation4], %s993_s26 }
 0x2e7   : > { %1424 = dma.done.wait (%p1178_p13), %s994_s1, 256  }
 0x2e8   : > { %1426 = vsyncadd (%p1178_p13), %s994_s1, 4294967040  ;;  %s1901_s12 = sld [smem:[#allocation20_spill]]  ;;  %s1903_s30 = smov %s1433_s10 }
 0x2e9   : > { %s1902_s15 = sld [smem:[#allocation21_spill]]  ;;  %s1904_s10 = smov %s1437_s11 }
 0x2ee   : > { %p24_p1 = scmp.ge.s32.totalorder %s1901_s12, 4  }
 0x2ef   : > { %s1905_s11 = smov %s1902_s15 }
 0x2f0   :  { %26 = sbr.rel (!%p24_p1) target bundleno = 10 (0xa), region = 122 }
 0x2f5   :  { %1000 = vsyncpa [#allocation3], 1 }
 0x2f6   :  { %1002 = vsyncpa [#allocation3 + $0x1], 1 }
 0x2f7   :  { %1003 = vsyncpa [#allocation6], 1 }
 0x2f8   :  { %1004 = vsyncpa [#allocation9], 1 }
 0x2f9   :  { %1005 = vsyncpa [#allocation4], 1 }
 0x2fa   :  { %1007 = vsyncpa [#allocation4 + $0x1], 1 }

</bundles_post_ra>
